<compile_context>
chip_gen: v7x
topology: tpu7x:2x2x1
jax: 0.10.0
libtpu: 0.0.40
codegen_flags: <defaults>
</compile_context>

<pallas_src>
import jax
import jax.numpy as jnp
from jax.experimental import pallas as pl
from jax.experimental.pallas import tpu as pltpu

EPS = 1e-5
LANE = 128                      # pad K and Cout to multiples of the lane width
TM_MAX = 512                    # max rows of M per grid step
VMEM_LIMIT = 32 * 1024 * 1024   # explicit scoped-VMEM budget (safe on v5e/v6e/v7x)


def _cdiv(a, b):
    return (a + b - 1) // b


def _round_up(x, m):
    return (x + m - 1) // m * m


def _pad2d(a, rows, cols):
    r, c = a.shape
    return jnp.pad(a, ((0, rows - r), (0, cols - c)))


def _pick_tiles(m):
    """Pick (tm, m_pad): >=2 even number of tiles, minimal row padding."""
    n = max(2, _cdiv(m, TM_MAX))
    if n % 2:
        n += 1                       # even tile count -> v7x 2-TC balance
    tm = _round_up(_cdiv(m, n), 16)  # 16-row alignment (bf16 sublane packing)
    return tm, n * tm


def _compiler_params():
    return pltpu.CompilerParams(dimension_semantics=("parallel",),
                                vmem_limit_bytes=VMEM_LIMIT)


# ---------------------------------------------------------------------------
# Pallas kernels
# ---------------------------------------------------------------------------
def _mm_stats_kernel(x_ref, w_ref, y_ref, st_ref):
    # x: (TM, Kp) bf16 patches, w: (Kp, Cp) bf16 -> y: (TM, Cp) bf16 store,
    # stats computed from the f32 MXU accumulate before the down-cast.
    y = jnp.dot(x_ref[...], w_ref[...], preferred_element_type=jnp.float32)
    y_ref[...] = y.astype(y_ref.dtype)
    st_ref[0, 0:1, :] = jnp.sum(y, axis=0, keepdims=True)
    st_ref[0, 1:2, :] = jnp.sum(y * y, axis=0, keepdims=True)


def _bn_relu_kernel(y_ref, s_ref, b_ref, o_ref):
    # folded BN + ReLU: relu(y*scale + bias); bf16 in/out, f32 math.
    y = y_ref[...].astype(jnp.float32)
    o_ref[...] = jnp.maximum(y * s_ref[...] + b_ref[...], 0.0).astype(o_ref.dtype)


def _bn_add_relu_kernel(y_ref, s_ref, b_ref, r_ref, rs_ref, rb_ref, o_ref):
    # projection shortcut: relu(y*s + b + res*rs + rb); fuses bn2, shortcut BN,
    # residual add and the final ReLU.
    y = y_ref[...].astype(jnp.float32)
    r = r_ref[...].astype(jnp.float32)
    o_ref[...] = jnp.maximum(
        y * s_ref[...] + b_ref[...] + r * rs_ref[...] + rb_ref[...],
        0.0).astype(o_ref.dtype)


def _bn_addid_relu_kernel(y_ref, s_ref, b_ref, r_ref, o_ref):
    # identity shortcut: relu(y*s + b + res); no dead FMA on the residual.
    y = y_ref[...].astype(jnp.float32)
    r = r_ref[...].astype(jnp.float32)
    o_ref[...] = jnp.maximum(y * s_ref[...] + b_ref[...] + r, 0.0).astype(o_ref.dtype)


# ---------------------------------------------------------------------------
# pallas_call wrappers
# ---------------------------------------------------------------------------
def conv_matmul_stats(patches, w, m_real, tm):
    """Tiled matmul producing bf16 pre-BN activations plus f32 batch stats."""
    m_pad, kp = patches.shape
    cp = w.shape[1]
    n_m = m_pad // tm
    y, st = pl.pallas_call(
        _mm_stats_kernel,
        out_shape=(jax.ShapeDtypeStruct((m_pad, cp), jnp.bfloat16),
                   jax.ShapeDtypeStruct((n_m, 2, cp), jnp.float32)),
        grid=(n_m,),
        in_specs=[pl.BlockSpec((tm, kp), lambda i: (i, 0)),
                  pl.BlockSpec((kp, cp), lambda i: (0, 0))],
        out_specs=(pl.BlockSpec((tm, cp), lambda i: (i, 0)),
                   pl.BlockSpec((1, 2, cp), lambda i: (i, 0, 0))),
        compiler_params=_compiler_params(),
    )(patches, w)
    # Tiny (n_m, 2, Cp) reduction + stat math stays in plain JAX (glue).
    tot = jnp.sum(st, axis=0)
    mean = tot[0] / m_real            # padded rows contribute exact zeros
    var = tot[1] / m_real - mean * mean
    return y, mean, var


def bn_fold(gamma, beta, mean, var, cp):
    """Fold BN into one FMA: scale = g*rsqrt(var+eps), bias = b - mean*scale."""
    g = jnp.pad(gamma.astype(jnp.float32), (0, cp - gamma.shape[0]))
    b = jnp.pad(beta.astype(jnp.float32), (0, cp - beta.shape[0]))
    scale = g * jax.lax.rsqrt(var + EPS)   # padded channels: g=0 -> scale=0
    bias = b - mean * scale                # padded channels: bias=0
    return scale.reshape(1, cp), bias.reshape(1, cp)


def bn_relu_apply(y, scale, bias, tm):
    m_pad, cp = y.shape
    n_m = m_pad // tm
    row = pl.BlockSpec((tm, cp), lambda i: (i, 0))
    vec = pl.BlockSpec((1, cp), lambda i: (0, 0))
    return pl.pallas_call(
        _bn_relu_kernel,
        out_shape=jax.ShapeDtypeStruct((m_pad, cp), jnp.bfloat16),
        grid=(n_m,),
        in_specs=[row, vec, vec],
        out_specs=row,
        compiler_params=_compiler_params(),
    )(y, scale, bias)


def bn_add_relu_apply(y, scale, bias, res, rscale, rbias, tm):
    m_pad, cp = y.shape
    n_m = m_pad // tm
    row = pl.BlockSpec((tm, cp), lambda i: (i, 0))
    vec = pl.BlockSpec((1, cp), lambda i: (0, 0))
    return pl.pallas_call(
        _bn_add_relu_kernel,
        out_shape=jax.ShapeDtypeStruct((m_pad, cp), jnp.float32),
        grid=(n_m,),
        in_specs=[row, vec, vec, row, vec, vec],
        out_specs=row,
        compiler_params=_compiler_params(),
    )(y, scale, bias, res, rscale, rbias)


def bn_add_identity_relu_apply(y, scale, bias, res, tm):
    m_pad, cp = y.shape
    n_m = m_pad // tm
    row = pl.BlockSpec((tm, cp), lambda i: (i, 0))
    vec = pl.BlockSpec((1, cp), lambda i: (0, 0))
    return pl.pallas_call(
        _bn_addid_relu_kernel,
        out_shape=jax.ShapeDtypeStruct((m_pad, cp), jnp.float32),
        grid=(n_m,),
        in_specs=[row, vec, vec, row],
        out_specs=row,
        compiler_params=_compiler_params(),
    )(y, scale, bias, res)


# ---------------------------------------------------------------------------
# Plain-JAX glue: im2col patch extraction (NHWC input, bf16 throughout).
# ---------------------------------------------------------------------------
def im2col(x_nhwc, k, stride, pad):
    B, H, W, C = x_nhwc.shape
    xp = jnp.pad(x_nhwc, ((0, 0), (pad, pad), (pad, pad), (0, 0)))
    Ho = (H + 2 * pad - k) // stride + 1
    Wo = (W + 2 * pad - k) // stride + 1
    cols = []
    for ky in range(k):
        for kx in range(k):
            patch = xp[:,
                       ky:ky + (Ho - 1) * stride + 1:stride,
                       kx:kx + (Wo - 1) * stride + 1:stride,
                       :]
            cols.append(patch)
    patches = jnp.concatenate(cols, axis=-1).reshape(B * Ho * Wo, k * k * C)
    return patches, Ho, Wo


# ---------------------------------------------------------------------------
# BasicBlock forward (matches the PyTorch module, training-mode BatchNorm).
# ---------------------------------------------------------------------------
def basic_block_forward(x_nchw, params, stride):
    # bf16 activations on the wire (MXU feed + halved HBM traffic); all
    # accumulation, BN statistics and the folded-BN FMA stay f32.
    x = jnp.transpose(x_nchw, (0, 2, 3, 1)).astype(jnp.bfloat16)  # NHWC bf16
    B, H, W, Cin = x.shape
    planes = params["w1"].shape[0]
    cp = _round_up(planes, LANE)

    # ---- conv1 (3x3, stride, pad=1) -> bn1 -> relu -------------------------
    p1, Ho, Wo = im2col(x, 3, stride, 1)                          # bf16 patches
    M = B * Ho * Wo
    tm, m_pad = _pick_tiles(M)

    k1 = p1.shape[1]
    k1p = _round_up(k1, LANE)
    p1p = _pad2d(p1, m_pad, k1p)                                  # bf16
    w1 = params["w1"].transpose(2, 3, 1, 0).reshape(k1, planes)   # (ky,kx,I),O
    w1p = _pad2d(w1, k1p, cp).astype(jnp.bfloat16)

    y1, m1, v1 = conv_matmul_stats(p1p, w1p, M, tm)               # y1 bf16
    s1, b1 = bn_fold(params["g1"], params["b1"], m1, v1, cp)
    out1 = bn_relu_apply(y1, s1, b1, tm)                          # (m_pad,cp) bf16
    out1_img = out1[:M, :planes].reshape(B, Ho, Wo, planes)

    # ---- shortcut ----------------------------------------------------------
    has_proj = (stride != 1 or Cin != planes)
    if has_proj:
        xs = x[:, ::stride, ::stride, :].reshape(M, Cin)          # 1x1 conv rows
        ksp = _round_up(Cin, LANE)
        xsp = _pad2d(xs, m_pad, ksp)                              # bf16
        ws = params["ws"].transpose(2, 3, 1, 0).reshape(Cin, planes)
        wsp = _pad2d(ws, ksp, cp).astype(jnp.bfloat16)
        ysc, ms, vs = conv_matmul_stats(xsp, wsp, M, tm)          # bf16 pre-BN
        rscale, rbias = bn_fold(params["gs"], params["bs"], ms, vs, cp)
    else:
        res_id = _pad2d(x.reshape(M, Cin), m_pad, cp)             # bf16 residual

    # ---- conv2 (3x3, s=1, pad=1) -> bn2 -> (+shortcut) -> relu (fused) -----
    p2, _, _ = im2col(out1_img, 3, 1, 1)                          # bf16 patches
    k2 = p2.shape[1]
    k2p = _round_up(k2, LANE)
    p2p = _pad2d(p2, m_pad, k2p)
    w2 = params["w2"].transpose(2, 3, 1, 0).reshape(k2, planes)
    w2p = _pad2d(w2, k2p, cp).astype(jnp.bfloat16)

    y2, m2, v2 = conv_matmul_stats(p2p, w2p, M, tm)               # y2 bf16
    s2, b2 = bn_fold(params["g2"], params["b2"], m2, v2, cp)
    if has_proj:
        out2 = bn_add_relu_apply(y2, s2, b2, ysc, rscale, rbias, tm)
    else:
        out2 = bn_add_identity_relu_apply(y2, s2, b2, res_id, tm)

    out = out2[:M, :planes].reshape(B, Ho, Wo, planes)
    return jnp.transpose(out, (0, 3, 1, 2)).astype(jnp.float32)   # back to NCHW


# ---------------------------------------------------------------------------
# Pure-JAX reference (lax.conv, f32) for the correctness check.
# ---------------------------------------------------------------------------
def ref_forward(x, params, stride):
    def conv(a, w, s, p):
        return jax.lax.conv_general_dilated(
            a, w, (s, s), ((p, p), (p, p)),
            dimension_numbers=("NCHW", "OIHW", "NCHW"))

    def bn(a, g, b):
        mean = a.mean(axis=(0, 2, 3), keepdims=True)
        var = jnp.square(a - mean).mean(axis=(0, 2, 3), keepdims=True)
        return (g.reshape(1, -1, 1, 1) * (a - mean) / jnp.sqrt(var + EPS)
                + b.reshape(1, -1, 1, 1))

    planes = params["w1"].shape[0]
    out = jax.nn.relu(bn(conv(x, params["w1"], stride, 1), params["g1"], params["b1"]))
    out = bn(conv(out, params["w2"], 1, 1), params["g2"], params["b2"])
    if stride != 1 or x.shape[1] != planes:
        sc = bn(conv(x, params["ws"], stride, 0), params["gs"], params["bs"])
    else:
        sc = x
    return jax.nn.relu(out + sc)


def make_params(key, cin, planes, with_shortcut):
    ks = jax.random.split(key, 9)
    p = {
        "w1": 0.1 * jax.random.normal(ks[0], (planes, cin, 3, 3), jnp.float32),
        "g1": 1.0 + 0.1 * jax.random.normal(ks[1], (planes,), jnp.float32),
        "b1": 0.1 * jax.random.normal(ks[2], (planes,), jnp.float32),
        "w2": 0.1 * jax.random.normal(ks[3], (planes, planes, 3, 3), jnp.float32),
        "g2": 1.0 + 0.1 * jax.random.normal(ks[4], (planes,), jnp.float32),
        "b2": 0.1 * jax.random.normal(ks[5], (planes,), jnp.float32),
    }
    if with_shortcut:
        p["ws"] = 0.1 * jax.random.normal(ks[6], (planes, cin, 1, 1), jnp.float32)
        p["gs"] = 1.0 + 0.1 * jax.random.normal(ks[7], (planes,), jnp.float32),
        p["gs"] = p["gs"][0]
        p["bs"] = 0.1 * jax.random.normal(ks[8], (planes,), jnp.float32)
    return p


if __name__ == "__main__":
    root = jax.random.PRNGKey(0)
    k_p1, k_p2, k_x1, k_x2 = jax.random.split(root, 4)

    fwd = jax.jit(basic_block_forward, static_argnums=2)

    # Case 1: projection shortcut (stride=2, channel change).
    B, Cin, H, W, planes, stride = 2, 4, 16, 16, 8, 2
    params1 = make_params(k_p1, Cin, planes, with_shortcut=True)
    x1 = jax.random.normal(k_x1, (B, Cin, H, W), jnp.float32)
    out1 = jax.block_until_ready(fwd(x1, params1, stride))
    ref1 = jax.block_until_ready(ref_forward(x1, params1, stride))
    assert out1.shape == (B, planes, H // stride, W // stride), out1.shape
    # bf16 MXU feed + bf16 activation storage (f32 accumulate / BN math)
    # -> tolerance loosened vs the pure-f32 reference.
    err1 = float(jnp.max(jnp.abs(out1 - ref1)))
    assert jnp.allclose(out1, ref1, atol=1e-1, rtol=1e-1), err1

    # Case 2: identity shortcut (stride=1, same channels).
    params2 = make_params(k_p2, planes, planes, with_shortcut=False)
    x2 = jax.random.normal(k_x2, (B, planes, H, W), jnp.float32)
    out2 = jax.block_until_ready(fwd(x2, params2, 1))
    ref2 = jax.block_until_ready(ref_forward(x2, params2, 1))
    assert out2.shape == (B, planes, H, W), out2.shape
    err2 = float(jnp.max(jnp.abs(out2 - ref2)))
    assert jnp.allclose(out2, ref2, atol=1e-1, rtol=1e-1), err2

    print("KERNEL_OK")
</pallas_src>

<mosaic_0001>
module attributes {stable_mosaic.version = 11 : i64} {
  func.func @_bn_relu_kernel(%arg0: i32, %arg1: memref<64x128xbf16, #tpu.memory_space<vmem>>, %arg2: memref<1x128xf32, #tpu.memory_space<vmem>>, %arg3: memref<1x128xf32, #tpu.memory_space<vmem>>, %arg4: memref<64x128xbf16, #tpu.memory_space<vmem>>) attributes {dimension_semantics = [#tpu.dimension_semantics<parallel>], iteration_bounds = array<i64: 2>, scalar_prefetch = 0 : i64, scratch_operands = 0 : i64, tpu.core_type = #tpu.core_type<tc>, window_params = [{transform_indices = @transform_0, window_bounds = array<i64: 64, 128>}, {pipeline_mode = #tpu.pipeline_mode<synchronous>, transform_indices = @transform_1, window_bounds = array<i64: 1, 128>}, {pipeline_mode = #tpu.pipeline_mode<synchronous>, transform_indices = @transform_2, window_bounds = array<i64: 1, 128>}, {transform_indices = @transform_3, window_bounds = array<i64: 64, 128>}]} {
    %c0 = arith.constant 0 : index
    %c0_0 = arith.constant 0 : index
    %0 = vector.load %arg1[%c0, %c0_0] : memref<64x128xbf16, #tpu.memory_space<vmem>>, vector<64x128xbf16>
    %1 = arith.extf %0 : vector<64x128xbf16> to vector<64x128xf32>
    %c0_1 = arith.constant 0 : index
    %c0_2 = arith.constant 0 : index
    %2 = vector.load %arg2[%c0_1, %c0_2] : memref<1x128xf32, #tpu.memory_space<vmem>>, vector<1x128xf32>
    %3 = vector.broadcast %2 : vector<1x128xf32> to vector<64x128xf32>
    %4 = arith.mulf %1, %3 : vector<64x128xf32>
    %c0_3 = arith.constant 0 : index
    %c0_4 = arith.constant 0 : index
    %5 = vector.load %arg3[%c0_3, %c0_4] : memref<1x128xf32, #tpu.memory_space<vmem>>, vector<1x128xf32>
    %6 = vector.broadcast %5 : vector<1x128xf32> to vector<64x128xf32>
    %7 = arith.addf %4, %6 : vector<64x128xf32>
    %cst = arith.constant 0.000000e+00 : f32
    %8 = vector.broadcast %cst : f32 to vector<64x128xf32>
    %9 = arith.maximumf %7, %8 : vector<64x128xf32>
    %10 = arith.truncf %9 : vector<64x128xf32> to vector<64x128xbf16>
    %c0_5 = arith.constant 0 : index
    %c0_6 = arith.constant 0 : index
    %11 = vector.load %arg4[%c0_5, %c0_6] : memref<64x128xbf16, #tpu.memory_space<vmem>>, vector<64x128xbf16>
    tpu.vector_store %arg4[%c0_5, %c0_6], %10 {strides = array<i32>} : memref<64x128xbf16, #tpu.memory_space<vmem>>, vector<64x128xbf16>,
    return
  }
  func.func @transform_0(%arg0: i32) -> (i32, i32) {
    %c0_i32 = arith.constant 0 : i32
    %c0_i32_0 = arith.constant 0 : i32
    return %arg0, %c0_i32 : i32, i32
  }
  func.func @transform_1(%arg0: i32) -> (i32, i32) {
    %c0_i32 = arith.constant 0 : i32
    %c0_i32_0 = arith.constant 0 : i32
    %c0_i32_1 = arith.constant 0 : i32
    return %c0_i32, %c0_i32_0 : i32, i32
  }
  func.func @transform_2(%arg0: i32) -> (i32, i32) {
    %c0_i32 = arith.constant 0 : i32
    %c0_i32_0 = arith.constant 0 : i32
    %c0_i32_1 = arith.constant 0 : i32
    return %c0_i32, %c0_i32_0 : i32, i32
  }
  func.func @transform_3(%arg0: i32) -> (i32, i32) {
    %c0_i32 = arith.constant 0 : i32
    %c0_i32_0 = arith.constant 0 : i32
    return %arg0, %c0_i32 : i32, i32
  }
}

module attributes {stable_mosaic.version = 11 : i64} {
  func.func @_mm_stats_kernel(%arg0: i32, %arg1: memref<64x128xbf16, #tpu.memory_space<vmem>>, %arg2: memref<128x128xbf16, #tpu.memory_space<vmem>>, %arg3: memref<64x128xbf16, #tpu.memory_space<vmem>>, %arg4: memref<1x2x128xf32, #tpu.memory_space<vmem>>) attributes {dimension_semantics = [#tpu.dimension_semantics<parallel>], iteration_bounds = array<i64: 2>, scalar_prefetch = 0 : i64, scratch_operands = 0 : i64, tpu.core_type = #tpu.core_type<tc>, window_params = [{transform_indices = @transform_0, window_bounds = array<i64: 64, 128>}, {pipeline_mode = #tpu.pipeline_mode<synchronous>, transform_indices = @transform_1, window_bounds = array<i64: 128, 128>}, {transform_indices = @transform_2, window_bounds = array<i64: 64, 128>}, {transform_indices = @transform_3, window_bounds = array<i64: 1, 2, 128>}]} {
    %c0 = arith.constant 0 : index
    %c0_0 = arith.constant 0 : index
    %0 = vector.load %arg1[%c0, %c0_0] : memref<64x128xbf16, #tpu.memory_space<vmem>>, vector<64x128xbf16>
    %c0_1 = arith.constant 0 : index
    %c0_2 = arith.constant 0 : index
    %1 = vector.load %arg2[%c0_1, %c0_2] : memref<128x128xbf16, #tpu.memory_space<vmem>>, vector<128x128xbf16>
    %cst = arith.constant dense<0.000000e+00> : vector<64x128xf32>
    %2 = tpu.matmul %0, %1, %cst {dimension_numbers = #tpu.dot_dimension_numbers<[1], [0], [0], [1], [0, 0, 1, 1], [], []>} : vector<64x128xbf16>, vector<128x128xbf16>, vector<64x128xf32> -> vector<64x128xf32>
    %3 = arith.truncf %2 : vector<64x128xf32> to vector<64x128xbf16>
    %c0_3 = arith.constant 0 : index
    %c0_4 = arith.constant 0 : index
    %4 = vector.load %arg3[%c0_3, %c0_4] : memref<64x128xbf16, #tpu.memory_space<vmem>>, vector<64x128xbf16>
    tpu.vector_store %arg3[%c0_3, %c0_4], %3 {strides = array<i32>} : memref<64x128xbf16, #tpu.memory_space<vmem>>, vector<64x128xbf16>,
    %cst_5 = arith.constant dense<0.000000e+00> : vector<128xf32>
    %5 = vector.multi_reduction <add>, %2, %cst_5 [0] : vector<64x128xf32> to vector<128xf32>
    %6 = vector.shape_cast %5 : vector<128xf32> to vector<1x128xf32>
    %c0_6 = arith.constant 0 : index
    %c0_7 = arith.constant 0 : index
    %c0_8 = arith.constant 0 : index
    %7 = vector.load %arg4[%c0_6, %c0_7, %c0_8] : memref<1x2x128xf32, #tpu.memory_space<vmem>>, vector<1x1x128xf32>
    %8 = vector.shape_cast %7 : vector<1x1x128xf32> to vector<1x128xf32>
    %9 = vector.shape_cast %6 : vector<1x128xf32> to vector<1x1x128xf32>
    tpu.vector_store %arg4[%c0_6, %c0_7, %c0_8], %9 {strides = array<i32>} : memref<1x2x128xf32, #tpu.memory_space<vmem>>, vector<1x1x128xf32>,
    %10 = arith.mulf %2, %2 : vector<64x128xf32>
    %cst_9 = arith.constant dense<0.000000e+00> : vector<128xf32>
    %11 = vector.multi_reduction <add>, %10, %cst_9 [0] : vector<64x128xf32> to vector<128xf32>
    %12 = vector.shape_cast %11 : vector<128xf32> to vector<1x128xf32>
    %c0_10 = arith.constant 0 : index
    %c1 = arith.constant 1 : index
    %c0_11 = arith.constant 0 : index
    %13 = vector.load %arg4[%c0_10, %c1, %c0_11] : memref<1x2x128xf32, #tpu.memory_space<vmem>>, vector<1x1x128xf32>
    %14 = vector.shape_cast %13 : vector<1x1x128xf32> to vector<1x128xf32>
    %15 = vector.shape_cast %12 : vector<1x128xf32> to vector<1x1x128xf32>
    tpu.vector_store %arg4[%c0_10, %c1, %c0_11], %15 {strides = array<i32>} : memref<1x2x128xf32, #tpu.memory_space<vmem>>, vector<1x1x128xf32>,
    return
  }
  func.func @transform_0(%arg0: i32) -> (i32, i32) {
    %c0_i32 = arith.constant 0 : i32
    %c0_i32_0 = arith.constant 0 : i32
    return %arg0, %c0_i32 : i32, i32
  }
  func.func @transform_1(%arg0: i32) -> (i32, i32) {
    %c0_i32 = arith.constant 0 : i32
    %c0_i32_0 = arith.constant 0 : i32
    %c0_i32_1 = arith.constant 0 : i32
    return %c0_i32, %c0_i32_0 : i32, i32
  }
  func.func @transform_2(%arg0: i32) -> (i32, i32) {
    %c0_i32 = arith.constant 0 : i32
    %c0_i32_0 = arith.constant 0 : i32
    return %arg0, %c0_i32 : i32, i32
  }
  func.func @transform_3(%arg0: i32) -> (i32, i32, i32) {
    %c0_i32 = arith.constant 0 : i32
    %c0_i32_0 = arith.constant 0 : i32
    %c0_i32_1 = arith.constant 0 : i32
    return %arg0, %c0_i32, %c0_i32_0 : i32, i32, i32
  }
}

module attributes {stable_mosaic.version = 11 : i64} {
  func.func @_bn_add_relu_kernel(%arg0: i32, %arg1: memref<64x128xbf16, #tpu.memory_space<vmem>>, %arg2: memref<1x128xf32, #tpu.memory_space<vmem>>, %arg3: memref<1x128xf32, #tpu.memory_space<vmem>>, %arg4: memref<64x128xbf16, #tpu.memory_space<vmem>>, %arg5: memref<1x128xf32, #tpu.memory_space<vmem>>, %arg6: memref<1x128xf32, #tpu.memory_space<vmem>>, %arg7: memref<64x128xf32, #tpu.memory_space<vmem>>) attributes {dimension_semantics = [#tpu.dimension_semantics<parallel>], iteration_bounds = array<i64: 2>, scalar_prefetch = 0 : i64, scratch_operands = 0 : i64, tpu.core_type = #tpu.core_type<tc>, window_params = [{transform_indices = @transform_0, window_bounds = array<i64: 64, 128>}, {pipeline_mode = #tpu.pipeline_mode<synchronous>, transform_indices = @transform_1, window_bounds = array<i64: 1, 128>}, {pipeline_mode = #tpu.pipeline_mode<synchronous>, transform_indices = @transform_2, window_bounds = array<i64: 1, 128>}, {transform_indices = @transform_3, window_bounds = array<i64: 64, 128>}, {pipeline_mode = #tpu.pipeline_mode<synchronous>, transform_indices = @transform_4, window_bounds = array<i64: 1, 128>}, {pipeline_mode = #tpu.pipeline_mode<synchronous>, transform_indices = @transform_5, window_bounds = array<i64: 1, 128>}, {transform_indices = @transform_6, window_bounds = array<i64: 64, 128>}]} {
    %c0 = arith.constant 0 : index
    %c0_0 = arith.constant 0 : index
    %0 = vector.load %arg1[%c0, %c0_0] : memref<64x128xbf16, #tpu.memory_space<vmem>>, vector<64x128xbf16>
    %1 = arith.extf %0 : vector<64x128xbf16> to vector<64x128xf32>
    %c0_1 = arith.constant 0 : index
    %c0_2 = arith.constant 0 : index
    %2 = vector.load %arg4[%c0_1, %c0_2] : memref<64x128xbf16, #tpu.memory_space<vmem>>, vector<64x128xbf16>
    %3 = arith.extf %2 : vector<64x128xbf16> to vector<64x128xf32>
    %c0_3 = arith.constant 0 : index
    %c0_4 = arith.constant 0 : index
    %4 = vector.load %arg2[%c0_3, %c0_4] : memref<1x128xf32, #tpu.memory_space<vmem>>, vector<1x128xf32>
    %5 = vector.broadcast %4 : vector<1x128xf32> to vector<64x128xf32>
    %6 = arith.mulf %1, %5 : vector<64x128xf32>
    %c0_5 = arith.constant 0 : index
    %c0_6 = arith.constant 0 : index
    %7 = vector.load %arg3[%c0_5, %c0_6] : memref<1x128xf32, #tpu.memory_space<vmem>>, vector<1x128xf32>
    %8 = vector.broadcast %7 : vector<1x128xf32> to vector<64x128xf32>
    %9 = arith.addf %6, %8 : vector<64x128xf32>
    %c0_7 = arith.constant 0 : index
    %c0_8 = arith.constant 0 : index
    %10 = vector.load %arg5[%c0_7, %c0_8] : memref<1x128xf32, #tpu.memory_space<vmem>>, vector<1x128xf32>
    %11 = vector.broadcast %10 : vector<1x128xf32> to vector<64x128xf32>
    %12 = arith.mulf %3, %11 : vector<64x128xf32>
    %13 = arith.addf %9, %12 : vector<64x128xf32>
    %c0_9 = arith.constant 0 : index
    %c0_10 = arith.constant 0 : index
    %14 = vector.load %arg6[%c0_9, %c0_10] : memref<1x128xf32, #tpu.memory_space<vmem>>, vector<1x128xf32>
    %15 = vector.broadcast %14 : vector<1x128xf32> to vector<64x128xf32>
    %16 = arith.addf %13, %15 : vector<64x128xf32>
    %cst = arith.constant 0.000000e+00 : f32
    %17 = vector.broadcast %cst : f32 to vector<64x128xf32>
    %18 = arith.maximumf %16, %17 : vector<64x128xf32>
    %c0_11 = arith.constant 0 : index
    %c0_12 = arith.constant 0 : index
    %19 = vector.load %arg7[%c0_11, %c0_12] : memref<64x128xf32, #tpu.memory_space<vmem>>, vector<64x128xf32>
    tpu.vector_store %arg7[%c0_11, %c0_12], %18 {strides = array<i32>} : memref<64x128xf32, #tpu.memory_space<vmem>>, vector<64x128xf32>,
    return
  }
  func.func @transform_0(%arg0: i32) -> (i32, i32) {
    %c0_i32 = arith.constant 0 : i32
    %c0_i32_0 = arith.constant 0 : i32
    return %arg0, %c0_i32 : i32, i32
  }
  func.func @transform_1(%arg0: i32) -> (i32, i32) {
    %c0_i32 = arith.constant 0 : i32
    %c0_i32_0 = arith.constant 0 : i32
    %c0_i32_1 = arith.constant 0 : i32
    return %c0_i32, %c0_i32_0 : i32, i32
  }
  func.func @transform_2(%arg0: i32) -> (i32, i32) {
    %c0_i32 = arith.constant 0 : i32
    %c0_i32_0 = arith.constant 0 : i32
    %c0_i32_1 = arith.constant 0 : i32
    return %c0_i32, %c0_i32_0 : i32, i32
  }
  func.func @transform_3(%arg0: i32) -> (i32, i32) {
    %c0_i32 = arith.constant 0 : i32
    %c0_i32_0 = arith.constant 0 : i32
    return %arg0, %c0_i32 : i32, i32
  }
  func.func @transform_4(%arg0: i32) -> (i32, i32) {
    %c0_i32 = arith.constant 0 : i32
    %c0_i32_0 = arith.constant 0 : i32
    %c0_i32_1 = arith.constant 0 : i32
    return %c0_i32, %c0_i32_0 : i32, i32
  }
  func.func @transform_5(%arg0: i32) -> (i32, i32) {
    %c0_i32 = arith.constant 0 : i32
    %c0_i32_0 = arith.constant 0 : i32
    %c0_i32_1 = arith.constant 0 : i32
    return %c0_i32, %c0_i32_0 : i32, i32
  }
  func.func @transform_6(%arg0: i32) -> (i32, i32) {
    %c0_i32 = arith.constant 0 : i32
    %c0_i32_0 = arith.constant 0 : i32
    return %arg0, %c0_i32 : i32, i32
  }
}

</mosaic_0001>

<bundles_post_ra>
// kernel: basic_block_forward.6
= control target key start
LH: loop header
LB: loop body
LE: loop exit
PB: predicated region body
PF: predicated region fallthrough
CT: control target
= control target key end

     0   :  { %s431_s12 = smov 0   ;;  %s461_s0 = inlined_call_operand.vmem [shape: bf16[128,128], index: 0, kind: input, shape index: {}]   ;;  %s462_s1 = inlined_call_operand.vmem [shape: f32[1,128], index: 1, kind: input, shape index: {}]   ;;  %s463_s2 = inlined_call_operand.vmem [shape: f32[1,128], index: 2, kind: input, shape index: {}]   ;;  %s464_s3 = inlined_call_operand.vmem [shape: bf16[128,128], index: 3, kind: output, shape index: {}]  }
   0x1 LB: > { %s324_s13 = sadd.s32 4294967295, %s409_s12   ;;  %p328_p0 = scmp.ge.s32.totalorder %s409_s12, 1  ;;  %s409_s12 = sphi %s431_s12, %s13_s12  }
   0x2   : > { %p138_p1 = scmp.lt.s32.totalorder %s409_s12, 3 }
   0x4   : > { %p139_p2 = pnand %p328_p0, %p138_p1 }
   0x5   : > { %s329_s14 = sshll.u32 (!%p139_p2), %s324_s13, 3  ;;  %v333_v0 = vld [vmem:[%s462_s1] ss:$0 sm:$0xff] (!%p139_p2) }
   0x6   : > { %142 = sbr.rel (%p139_p2) target bundleno = 29 (0x1d), region = 32  ;;  %p163_p3 = scmp.lt.s32.totalorder (!%p139_p2), %s329_s14, 15  ;;  %v334_v9 = vld [vmem:[%s463_s2] ss:$0 sm:$0xff] (!%p139_p2) }
   0xd   : > { %s466_s14 = smov (!%p163_p3, %s329_s14), 15 }
   0xe   : > { %s330_s15 = sshll.u32 %s466_s14, 2 }
   0xf   : > { %s166_s18 = scalar_lea.vmem %s461_s0, %s330_s15  ;;  %s172_s25 = scalar_lea.vmem %s464_s3, %s330_s15 }
  0x10   : > { %v354_v1 = vld [vmem:[%s166_s18] sm:$0xff]   ;;  %v389_v2 = vld [vmem:[%s166_s18 + $0x8] sm:$0xff]   ;;  %v390_v3 = vld [vmem:[%s166_s18 + $0x10] sm:$0xff]  }
  0x11   : > { %v355_v4 = vunpack.c.l.bf16 %v354_v1  ;;  %v356_v5 = vunpack.c.h.bf16 %v354_v1  ;;  %v359_v6 = vunpack.c.l.bf16 %v389_v2  ;;  %v360_v7 = vunpack.c.h.bf16 %v389_v2  ;;  %v391_v8 = vld [vmem:[%s166_s18 + $0x18] sm:$0xff]  }
  0x12   : > { %v363_v10 = vunpack.c.l.bf16 %v390_v3  ;;  %v364_v11 = vunpack.c.h.bf16 %v390_v3  ;;  %v367_v12 = vunpack.c.l.bf16 %v391_v8  ;;  %v368_v13 = vunpack.c.h.bf16 %v391_v8 }
  0x13   : > { %v197_v14 = vmul.f32 %v355_v4, %v333_v0  ;;  %v198_v15 = vmul.f32 %v356_v5, %v333_v0  ;;  %v199_v16 = vmul.f32 %v359_v6, %v333_v0  ;;  %v200_v17 = vmul.f32 %v360_v7, %v333_v0 }
  0x14   : > { %v201_v18 = vmul.f32 %v363_v10, %v333_v0  ;;  %v202_v19 = vmul.f32 %v364_v11, %v333_v0  ;;  %v203_v20 = vmul.f32 %v367_v12, %v333_v0  ;;  %v204_v21 = vmul.f32 %v368_v13, %v333_v0 }
  0x15   : > { %v212_v22 = vadd.f32 %v334_v9, %v197_v14  ;;  %v213_v23 = vadd.f32 %v334_v9, %v198_v15  ;;  %v214_v24 = vadd.f32 %v334_v9, %v199_v16  ;;  %v215_v25 = vadd.f32 %v334_v9, %v200_v17 }
  0x16   : > { %v216_v26 = vadd.f32 %v334_v9, %v201_v18  ;;  %v217_v27 = vadd.f32 %v334_v9, %v202_v19  ;;  %v218_v28 = vadd.f32 %v334_v9, %v203_v20  ;;  %v219_v29 = vadd.f32 %v334_v9, %v204_v21 }
  0x17   : > { %v220_v30 = vmax.f32 %v212_v22, 0.0  ;;  %v221_v31 = vmax.f32 %v213_v23, 0.0  ;;  %v222_v32 = vmax.f32 %v214_v24, 0.0  ;;  %v223_v33 = vmax.f32 %v215_v25, 0.0 }
  0x18   : > { %v224_v34 = vmax.f32 %v216_v26, 0.0  ;;  %v225_v35 = vmax.f32 %v217_v27, 0.0  ;;  %v226_v36 = vmax.f32 %v218_v28, 0.0  ;;  %v227_v37 = vmax.f32 %v219_v29, 0.0 }
  0x19   : > { %v372_v38 = vpack.c.bf16 %v221_v31, %v220_v30  ;;  %v377_v39 = vpack.c.bf16 %v223_v33, %v222_v32 }
  0x1a   : > { %v382_v40 = vpack.c.bf16 %v225_v35, %v224_v34  ;;  %v387_v41 = vpack.c.bf16 %v227_v37, %v226_v36 }
  0x1b   : > { %373 = vst [vmem:[%s172_s25] sm:$0xff] %v372_v38   ;;  %392 = vst [vmem:[%s172_s25 + $0x8] sm:$0xff] %v377_v39  }
  0x1c   : > { %393 = vst [vmem:[%s172_s25 + $0x10] sm:$0xff] %v382_v40   ;;  %394 = vst [vmem:[%s172_s25 + $0x18] sm:$0xff] %v387_v41  }
  0x1d PF: > { %s13_s12 = sadd.s32 1, %s409_s12  }
  0x1e   : > { %p10_p4 = scmp.ge.s32.totalorder %s13_s12, 4  }
  0x20   :  { %12 = sbr.rel (!%p10_p4) target bundleno = 1 (0x1), region = 62 }

// kernel: basic_block_forward.5
= control target key start
LH: loop header
LB: loop body
LE: loop exit
PB: predicated region body
PF: predicated region fallthrough
CT: control target
= control target key end

     0   :  { %s673_s12 = smov 0   ;;  %s735_s0 = inlined_call_operand.vmem [shape: bf16[128,128], index: 0, kind: input, shape index: {}]   ;;  %s736_s1 = inlined_call_operand.vmem [shape: bf16[128,128], index: 1, kind: input, shape index: {}]   ;;  %s737_s2 = inlined_call_operand.vmem [shape: bf16[128,128], index: 2, kind: output, shape index: {0}]   ;;  %s738_s3 = inlined_call_operand.vmem [shape: f32[2,2,128], index: 3, kind: output, shape index: {1}]  }
   0x1 LB: > { %s679_s13 = sadd.s32 4294967295, %s651_s12   ;;  %p514_p0 = scmp.ge.s32.totalorder %s651_s12, 1  ;;  %s651_s12 = sphi %s673_s12, %s14_s12  }
   0x2   : > { %p141_p1 = scmp.lt.s32.totalorder %s651_s12, 3 }
   0x4   : > { %p142_p2 = pnand %p514_p0, %p141_p1 }
   0x5   : > { %v633_v0 = vld [vmem:[%s736_s1] sm:$0xff] (!%p142_p2)   ;;  %s515_s16 = sshll.u32 (!%p142_p2), %s679_s13, 3  ;;  %v634_v1 = vld [vmem:[%s736_s1 + $0x8] sm:$0xff] (!%p142_p2)   ;;  %v635_v2 = vld [vmem:[%s736_s1 + $0x10] sm:$0xff] (!%p142_p2)   ;;  %p181_p4 = scmp.lt.s32.totalorder (!%p142_p2), %s679_s13, 1 }
   0x6   : > { %145 = sbr.rel (%p142_p2) target bundleno = 282 (0x11a), region = 28  ;;  %p170_p3 = scmp.lt.s32.totalorder (!%p142_p2), %s515_s16, 15  ;;  %585 = vmatprep.subr.bf16.mxu0 (!%p142_p2), %v633_v0  ;;  %609 = vmatprep.subr.bf16.mxu1 (!%p142_p2), %v633_v0  ;;  %v636_v3 = vld [vmem:[%s736_s1 + $0x18] sm:$0xff] (!%p142_p2)   ;;  %v637_v6 = vld [vmem:[%s736_s1 + $0x20] sm:$0xff] (!%p142_p2)   ;;  %v638_v7 = vld [vmem:[%s736_s1 + $0x28] sm:$0xff] (!%p142_p2)  }
   0x7   : > { %586 = vmatpush3.bf16.msra.mxu0 (!%p142_p2), %v633_v0  ;;  %617 = vmatpush3.bf16.msra.mxu1 (!%p142_p2), %v633_v0  ;;  %v639_v8 = vld [vmem:[%s736_s1 + $0x30] sm:$0xff] (!%p142_p2)   ;;  %v640_v9 = vld [vmem:[%s736_s1 + $0x38] sm:$0xff] (!%p142_p2)  }
   0x8   : > { %587 = vmatprep.subr.bf16.mxu0 (!%p142_p2), %v634_v1  ;;  %610 = vmatprep.subr.bf16.mxu1 (!%p142_p2), %v634_v1 }
   0xb   : > { %588 = vmatpush3.bf16.msra.mxu0 (!%p142_p2), %v634_v1  ;;  %618 = vmatpush3.bf16.msra.mxu1 (!%p142_p2), %v634_v1 }
   0xc   : > { %589 = vmatprep.subr.bf16.mxu0 (!%p142_p2), %v635_v2  ;;  %611 = vmatprep.subr.bf16.mxu1 (!%p142_p2), %v635_v2 }
   0xd   : > { %s740_s16 = smov (!%p170_p3, %s515_s16), 15  ;;  %s742_s13 = smov (!%p181_p4, %s679_s13), 1 }
   0xe   : > { %s516_s21 = sshll.u32 %s740_s16, 2  ;;  %s519_s11 = sshll.u32 %s742_s13, 1 }
   0xf   : > { %s701_s24 = scalar_lea.vmem %s735_s0, %s516_s21  ;;  %590 = vmatpush3.bf16.msra.mxu0 %v635_v2  ;;  %619 = vmatpush3.bf16.msra.mxu1 %v635_v2  ;;  %s179_s10 = scalar_lea.vmem %s737_s2, %s516_s21 }
  0x10   : > { %v641_v4 = vld [vmem:[%s701_s24] sm:$0xff]   ;;  %v643_v5 = vld [vmem:[%s701_s24 + $0x10] sm:$0xff]   ;;  %591 = vmatprep.subr.bf16.mxu0 %v636_v3  ;;  %612 = vmatprep.subr.bf16.mxu1 %v636_v3  ;;  %v642_v10 = vld [vmem:[%s701_s24 + $0x8] sm:$0xff]   ;;  %s184_s16 = scalar_lea.vmem %s738_s3, %s519_s11 }
  0x11   : > { %601 = vmatprep.mubr.bf16.mxu0 %v641_v4  ;;  %605 = vmatprep.mubr.bf16.mxu1 %v643_v5  ;;  %v644_v11 = vld [vmem:[%s701_s24 + $0x18] sm:$0xff]  }
  0x13   : > { %592 = vmatpush3.bf16.msra.mxu0 %v636_v3  ;;  %620 = vmatpush3.bf16.msra.mxu1 %v636_v3 }
  0x14   : > { %593 = vmatprep.subr.bf16.mxu0 %v637_v6  ;;  %613 = vmatprep.subr.bf16.mxu1 %v637_v6 }
  0x17   : > { %594 = vmatpush3.bf16.msra.mxu0 %v637_v6  ;;  %621 = vmatpush3.bf16.msra.mxu1 %v637_v6 }
  0x18   : > { %595 = vmatprep.subr.bf16.mxu0 %v638_v7  ;;  %614 = vmatprep.subr.bf16.mxu1 %v638_v7 }
  0x1b   : > { %596 = vmatpush3.bf16.msra.mxu0 %v638_v7  ;;  %622 = vmatpush3.bf16.msra.mxu1 %v638_v7 }
  0x1c   : > { %597 = vmatprep.subr.bf16.mxu0 %v639_v8  ;;  %615 = vmatprep.subr.bf16.mxu1 %v639_v8 }
  0x1f   : > { %598 = vmatpush3.bf16.msra.mxu0 %v639_v8  ;;  %623 = vmatpush3.bf16.msra.mxu1 %v639_v8 }
  0x20   : > { %599 = vmatprep.subr.bf16.mxu0 %v640_v9  ;;  %616 = vmatprep.subr.bf16.mxu1 %v640_v9 }
  0x23   : > { %600 = vmatpush3.bf16.msra.mxu0 %v640_v9  ;;  %624 = vmatpush3.bf16.msra.mxu1 %v640_v9 }
  0x26   : > { %602 = vmatmul.mubr.bf16.vlgmr.msra.gmra.mrb[0].mxu0 %v642_v10  ;;  %606 = vmatmul.mubr.bf16.vlgmr.msra.gmra.mrb[0].mxu1 %v644_v11 }
  0xf9   : > { %v603_v12 = vpop.f32.mrb[0].mxu0  ;;  %v607_v13 = vpop.f32.mrb[0].mxu1 }
  0xfa   : > { %v316_v14 = vpop.f32.mrb[1].mxu0  ;;  %v332_v15 = vpop.f32.mrb[1].mxu1  ;;  %v403_v27 = vmul.f32 %v603_v12, %v603_v12  ;;  %v407_v39 = vmul.f32 %v607_v13, %v607_v13 }
  0xfb   : > { %v604_v16 = vpop.f32.mrb[2].mxu0  ;;  %v608_v17 = vpop.f32.mrb[2].mxu1  ;;  %v401_v18 = vmul.f32 %v316_v14, %v316_v14  ;;  %v405_v33 = vmul.f32 %v332_v15, %v332_v15 }
  0xfc   : > { %v558_v19 = vpack.c.bf16 %v604_v16, %v603_v12  ;;  %v319_v20 = vpop.f32.mrb[3].mxu0  ;;  %v568_v21 = vpack.c.bf16 %v608_v17, %v607_v13  ;;  %v335_v22 = vpop.f32.mrb[3].mxu1  ;;  %v404_v30 = vmul.f32 %v604_v16, %v604_v16  ;;  %v408_v42 = vmul.f32 %v608_v17, %v608_v17 }
  0xfd   : > { %v553_v23 = vpack.c.bf16 %v319_v20, %v316_v14  ;;  %v387_v24 = vadd.f32 %v319_v20, %v316_v14  ;;  %v402_v25 = vmul.f32 %v319_v20, %v319_v20  ;;  %v563_v26 = vpack.c.bf16 %v335_v22, %v332_v15 }
  0xfe   : > { %570 = vst [vmem:[%s179_s10 + $0x8] sm:$0xff] %v558_v19   ;;  %572 = vst [vmem:[%s179_s10 + $0x18] sm:$0xff] %v568_v21   ;;  %v406_v38 = vmul.f32 %v335_v22, %v335_v22 }
  0xff   : > { %554 = vst [vmem:[%s179_s10] sm:$0xff] %v553_v23   ;;  %v388_v28 = vadd.f32 %v603_v12, %v387_v24  ;;  %v409_v29 = vadd.f32 %v402_v25, %v401_v18  ;;  %571 = vst [vmem:[%s179_s10 + $0x10] sm:$0xff] %v563_v26  }
 0x101   : > { %v410_v31 = vadd.f32 %v409_v29, %v403_v27  ;;  %v389_v32 = vadd.f32 %v604_v16, %v388_v28 }
 0x103   : > { %v390_v34 = vadd.f32 %v389_v32, %v332_v15  ;;  %v411_v35 = vadd.f32 %v410_v31, %v404_v30 }
 0x105   : > { %v412_v36 = vadd.f32 %v411_v35, %v405_v33  ;;  %v391_v37 = vadd.f32 %v390_v34, %v335_v22 }
 0x107   : > { %v392_v40 = vadd.f32 %v607_v13, %v391_v37  ;;  %v413_v41 = vadd.f32 %v412_v36, %v406_v38 }
 0x109   : > { %v393_v43 = vadd.f32 %v608_v17, %v392_v40  ;;  %v414_v44 = vadd.f32 %v413_v41, %v407_v39 }
 0x10b   : > { %v394_v45 = vrot.slane %v393_v43, 4  ;;  %v415_v46 = vadd.f32 %v414_v44, %v408_v42 }
 0x10d   : > { %v395_v47 = vadd.f32 %v394_v45, %v393_v43  ;;  %v416_v48 = vrot.slane %v415_v46, 4 }
 0x10f   : > { %v396_v49 = vrot.slane %v395_v47, 2  ;;  %v417_v50 = vadd.f32 %v416_v48, %v415_v46 }
 0x111   : > { %v397_v51 = vadd.f32 %v396_v49, %v395_v47  ;;  %v418_v52 = vrot.slane %v417_v50, 2 }
 0x113   : > { %v398_v53 = vrot.slane %v397_v51, 1  ;;  %v419_v54 = vadd.f32 %v418_v52, %v417_v50 }
 0x115   : > { %v399_v55 = vadd.f32 %v398_v53, %v397_v51  ;;  %v420_v56 = vrot.slane %v419_v54, 1 }
 0x117   : > { %400 = vst [vmem:[%s184_s16] sm:$0x1] %v399_v55  ;;  %v421_v57 = vadd.f32 %v420_v56, %v419_v54 }
 0x119   : > { %422 = vst [vmem:[%s184_s16 + $0x1] sm:$0x1] %v421_v57 }
 0x11a PF: > { %s14_s12 = sadd.s32 1, %s651_s12  }
 0x11b   : > { %p11_p5 = scmp.ge.s32.totalorder %s14_s12, 4  }
 0x11d   :  { %13 = sbr.rel (!%p11_p5) target bundleno = 1 (0x1), region = 70 }

// kernel: basic_block_forward.9
= control target key start
LH: loop header
LB: loop body
LE: loop exit
PB: predicated region body
PF: predicated region fallthrough
CT: control target
= control target key end

     0   :  { %s567_s21 = smov 0   ;;  %s655_s0 = inlined_call_operand.vmem [shape: bf16[128,128], index: 0, kind: input, shape index: {}]   ;;  %s656_s1 = inlined_call_operand.vmem [shape: f32[1,128], index: 1, kind: input, shape index: {}]   ;;  %s657_s2 = inlined_call_operand.vmem [shape: f32[1,128], index: 2, kind: input, shape index: {}]   ;;  %s658_s3 = inlined_call_operand.vmem [shape: bf16[128,128], index: 3, kind: input, shape index: {}]   ;;  %s659_s4 = inlined_call_operand.vmem [shape: f32[1,128], index: 4, kind: input, shape index: {}]   ;;  %s660_s5 = inlined_call_operand.vmem [shape: f32[1,128], index: 5, kind: input, shape index: {}]   ;;  %s661_s6 = inlined_call_operand.vmem [shape: f32[128,128], index: 6, kind: output, shape index: {}]  }
   0x1 LB: > { %s461_s22 = sadd.s32 4294967295, %s530_s21   ;;  %p465_p0 = scmp.ge.s32.totalorder %s530_s21, 1  ;;  %s530_s21 = sphi %s567_s21, %s16_s21  }
   0x2   : > { %p224_p1 = scmp.lt.s32.totalorder %s530_s21, 3 }
   0x4   : > { %p225_p2 = pnand %p465_p0, %p224_p1 }
   0x5   : > { %s466_s23 = sshll.u32 (!%p225_p2), %s461_s22, 3  ;;  %v591_v0 = vld [vmem:[%s656_s1] ss:$0 sm:$0xff] (!%p225_p2) }
   0x6   : > { %228 = sbr.rel (%p225_p2) target bundleno = 42 (0x2a), region = 44  ;;  %p260_p3 = scmp.lt.s32.totalorder (!%p225_p2), %s466_s23, 15  ;;  %v596_v1 = vld [vmem:[%s659_s4] ss:$0 sm:$0xff] (!%p225_p2) }
   0x7   : > { %v605_v10 = vld [vmem:[%s657_s2] ss:$0 sm:$0xff] (!%p225_p2) }
   0x8   : > { %v475_v29 = vld [vmem:[%s660_s5] ss:$0 sm:$0xff] (!%p225_p2) }
   0xd   : > { %s663_s23 = smov (!%p260_p3, %s466_s23), 15 }
   0xe   : > { %s467_s24 = sshll.u32 %s663_s23, 2  ;;  %s471_s15 = sshll.u32 %s663_s23, 3 }
   0xf   : > { %s581_s27 = scalar_lea.vmem %s655_s0, %s467_s24  ;;  %s586_s30 = scalar_lea.vmem %s658_s3, %s467_s24 }
  0x10   : > { %v479_v2 = vld [vmem:[%s581_s27] sm:$0xff]   ;;  %v510_v4 = vld [vmem:[%s581_s27 + $0x8] sm:$0xff]   ;;  %v511_v15 = vld [vmem:[%s581_s27 + $0x10] sm:$0xff]   ;;  %s635_s18 = scalar_lea.vmem %s661_s6, %s471_s15 }
  0x11   : > { %v495_v3 = vld [vmem:[%s586_s30] sm:$0xff]   ;;  %v480_v5 = vunpack.c.l.bf16 %v479_v2  ;;  %v481_v7 = vunpack.c.h.bf16 %v479_v2  ;;  %v513_v9 = vld [vmem:[%s586_s30 + $0x8] sm:$0xff]   ;;  %v484_v11 = vunpack.c.l.bf16 %v510_v4  ;;  %v485_v13 = vunpack.c.h.bf16 %v510_v4  ;;  %v514_v16 = vld [vmem:[%s586_s30 + $0x10] sm:$0xff]  }
  0x12   : > { %v496_v6 = vunpack.c.l.bf16 %v495_v3  ;;  %v497_v8 = vunpack.c.h.bf16 %v495_v3  ;;  %v500_v12 = vunpack.c.l.bf16 %v513_v9  ;;  %v501_v14 = vunpack.c.h.bf16 %v513_v9  ;;  %v512_v34 = vld [vmem:[%s581_s27 + $0x18] sm:$0xff]  }
  0x13   : > { %v316_v17 = vmul.f32 %v480_v5, %v591_v0  ;;  %v317_v19 = vmul.f32 %v481_v7, %v591_v0  ;;  %v318_v21 = vmul.f32 %v484_v11, %v591_v0  ;;  %v319_v23 = vmul.f32 %v485_v13, %v591_v0  ;;  %v515_v39 = vld [vmem:[%s586_s30 + $0x18] sm:$0xff]  }
  0x14   : > { %v346_v18 = vmul.f32 %v496_v6, %v596_v1  ;;  %v347_v20 = vmul.f32 %v497_v8, %v596_v1  ;;  %v348_v22 = vmul.f32 %v500_v12, %v596_v1  ;;  %v349_v24 = vmul.f32 %v501_v14, %v596_v1 }
  0x15   : > { %v331_v25 = vadd.f32 %v605_v10, %v316_v17  ;;  %v332_v26 = vadd.f32 %v605_v10, %v317_v19  ;;  %v488_v27 = vunpack.c.l.bf16 %v511_v15  ;;  %v504_v28 = vunpack.c.l.bf16 %v514_v16 }
  0x16   : > { %v333_v30 = vadd.f32 %v605_v10, %v318_v21  ;;  %v334_v31 = vadd.f32 %v605_v10, %v319_v23  ;;  %v489_v32 = vunpack.c.h.bf16 %v511_v15  ;;  %v505_v33 = vunpack.c.h.bf16 %v514_v16 }
  0x17   : > { %v354_v35 = vadd.f32 %v346_v18, %v331_v25  ;;  %v355_v36 = vadd.f32 %v347_v20, %v332_v26  ;;  %v320_v37 = vmul.f32 %v488_v27, %v591_v0  ;;  %v350_v38 = vmul.f32 %v504_v28, %v596_v1 }
  0x18   : > { %v356_v40 = vadd.f32 %v348_v22, %v333_v30  ;;  %v357_v41 = vadd.f32 %v349_v24, %v334_v31  ;;  %v321_v42 = vmul.f32 %v489_v32, %v591_v0  ;;  %v351_v43 = vmul.f32 %v505_v33, %v596_v1 }
  0x19   : > { %v369_v44 = vadd.f32 %v475_v29, %v354_v35  ;;  %v370_v45 = vadd.f32 %v475_v29, %v355_v36  ;;  %v335_v46 = vadd.f32 %v605_v10, %v320_v37  ;;  %v492_v47 = vunpack.c.l.bf16 %v512_v34 }
  0x1a   : > { %v371_v48 = vadd.f32 %v475_v29, %v356_v40  ;;  %v372_v49 = vadd.f32 %v475_v29, %v357_v41  ;;  %v336_v50 = vadd.f32 %v605_v10, %v321_v42  ;;  %v508_v51 = vunpack.c.l.bf16 %v515_v39 }
  0x1b   : > { %v377_v52 = vmax.f32 %v369_v44, 0.0  ;;  %v378_v53 = vmax.f32 %v370_v45, 0.0  ;;  %v358_v54 = vadd.f32 %v350_v38, %v335_v46  ;;  %v322_v55 = vmul.f32 %v492_v47, %v591_v0 }
  0x1c   : > { %v379_v56 = vmax.f32 %v371_v48, 0.0  ;;  %v380_v57 = vmax.f32 %v372_v49, 0.0  ;;  %v359_v58 = vadd.f32 %v351_v43, %v336_v50  ;;  %v352_v59 = vmul.f32 %v508_v51, %v596_v1 }
  0x1d   : > { %385 = vst [vmem:[%s635_s18] sm:$0xff] %v377_v52  ;;  %386 = vst [vmem:[%s635_s18 + $0x8] sm:$0xff] %v378_v53  ;;  %v373_v60 = vadd.f32 %v475_v29, %v358_v54  ;;  %v337_v61 = vadd.f32 %v605_v10, %v322_v55  ;;  %v493_v62 = vunpack.c.h.bf16 %v512_v34  ;;  %v509_v63 = vunpack.c.h.bf16 %v515_v39 }
  0x1e   : > { %387 = vst [vmem:[%s635_s18 + $0x10] sm:$0xff] %v379_v56  ;;  %388 = vst [vmem:[%s635_s18 + $0x18] sm:$0xff] %v380_v57  ;;  %v374_v2 = vadd.f32 %v475_v29, %v359_v58 }
  0x1f   : > { %v381_v3 = vmax.f32 %v373_v60, 0.0  ;;  %v360_v4 = vadd.f32 %v352_v59, %v337_v61  ;;  %v323_v5 = vmul.f32 %v493_v62, %v591_v0  ;;  %v353_v6 = vmul.f32 %v509_v63, %v596_v1 }
  0x20   : > { %v382_v7 = vmax.f32 %v374_v2, 0.0 }
  0x21   : > { %389 = vst [vmem:[%s635_s18 + $0x20] sm:$0xff] %v381_v3  ;;  %v375_v8 = vadd.f32 %v475_v29, %v360_v4  ;;  %v338_v9 = vadd.f32 %v605_v10, %v323_v5 }
  0x22   : > { %390 = vst [vmem:[%s635_s18 + $0x28] sm:$0xff] %v382_v7 }
  0x23   : > { %v383_v11 = vmax.f32 %v375_v8, 0.0  ;;  %v361_v12 = vadd.f32 %v353_v6, %v338_v9 }
  0x25   : > { %391 = vst [vmem:[%s635_s18 + $0x30] sm:$0xff] %v383_v11  ;;  %v376_v13 = vadd.f32 %v475_v29, %v361_v12 }
  0x27   : > { %v384_v14 = vmax.f32 %v376_v13, 0.0 }
  0x29   : > { %392 = vst [vmem:[%s635_s18 + $0x38] sm:$0xff] %v384_v14 }
  0x2a PF: > { %s16_s21 = sadd.s32 1, %s530_s21  }
  0x2b   : > { %p13_p4 = scmp.ge.s32.totalorder %s16_s21, 4  }
  0x2d   :  { %15 = sbr.rel (!%p13_p4) target bundleno = 1 (0x1), region = 77 }

</bundles_post_ra>
